<compile_context>
chip_gen: v7x
topology: tpu7x:2x2x1
jax: 0.10.0
libtpu: 0.0.40
codegen_flags: <defaults>
</compile_context>

<pallas_src>
import functools

import jax
import jax.numpy as jnp
from jax.experimental import pallas as pl
from jax.experimental.pallas import tpu as pltpu

_LANE = 128
_SUBLANE = 8


def _round_up(x: int, m: int) -> int:
    return ((x + m - 1) // m) * m


def _device_info():
    """(physical VMEM bytes per TensorCore, MXU width, TensorCores per chip)."""
    try:
        kind = jax.devices()[0].device_kind.lower()
    except Exception:  # pragma: no cover - defensive
        kind = ""
    if "v7" in kind:
        return 64 << 20, 256, 2
    if "v6" in kind:
        return 128 << 20, 256, 1
    # v5e / older: 128x128 MXU, one TensorCore used per kernel.
    return 128 << 20, 128, 1


def _align_dim(d: int, mxu_width: int) -> int:
    """Pad feature dims to 256 on 256-wide MXUs when the real dim >= 128,
    otherwise to 128 (lane width)."""
    align = mxu_width if (mxu_width >= 256 and d >= 128) else _LANE
    return _round_up(d, align)


# --------------------------------------------------------------------------
# Kernel
# --------------------------------------------------------------------------
def _fused_mlp_kernel(*refs, num_linear: int, compute_dtype, out_cols: int):
    """refs = (x_ref, w0, b0, w1, b1, ..., w_{L-1}, b_{L-1}, o_ref).

    Runs the full MLP for one batch tile entirely on-chip. ReLU follows every
    linear layer except the last."""
    x_ref = refs[0]
    o_ref = refs[-1]
    wb_refs = refs[1:-1]

    h = x_ref[...]
    for li in range(num_linear):
        w_ref = wb_refs[2 * li]
        b_ref = wb_refs[2 * li + 1]
        y = jnp.dot(
            h.astype(compute_dtype),
            w_ref[...],
            preferred_element_type=jnp.float32,
        )
        y = y + b_ref[...]           # (1, Dout_pad) f32 bias broadcasts
        if li < num_linear - 1:
            y = jnp.maximum(y, 0.0)  # ReLU on all but the last linear
        h = y

    out = h[:, :out_cols] if out_cols < h.shape[1] else h
    o_ref[...] = out.astype(o_ref.dtype)


# --------------------------------------------------------------------------
# Parameter init / preparation (padding + cast done ONCE, not per forward)
# --------------------------------------------------------------------------
def init_relu_inner_network_params(
    key, input_dim: int, num_layers: int, latent_dim: int, output_dim: int
):
    """Mirrors PyTorch's nn.Linear default init. W has shape
    (in_features, out_features) (transpose of PyTorch), b has (out_features,)."""
    dims = [(input_dim, latent_dim)]
    dims += [(latent_dim, latent_dim) for _ in range(1, num_layers)]
    dims += [(latent_dim, output_dim)]

    params = []
    for fan_in, fan_out in dims:
        key, kw, kb = jax.random.split(key, 3)
        bound = 1.0 / jnp.sqrt(jnp.float32(fan_in))
        w = jax.random.uniform(
            kw, (fan_in, fan_out), jnp.float32, minval=-bound, maxval=bound
        )
        b = jax.random.uniform(
            kb, (fan_out,), jnp.float32, minval=-bound, maxval=bound
        )
        params.append((w, b))
    return params


def prepare_relu_inner_network_params(
    params, *, compute_dtype=jnp.bfloat16, mxu_width: int | None = None
):
    """Pad + cast weights/biases once (removes per-call wrapper HBM traffic)."""
    if mxu_width is None:
        _, mxu_width, _ = _device_info()

    wb_padded = []
    true_dims = []
    for w, b in params:
        fi, fo = w.shape
        ip = _align_dim(fi, mxu_width)
        op = _align_dim(fo, mxu_width)
        w_pad = jnp.zeros((ip, op), dtype=compute_dtype)
        w_pad = w_pad.at[:fi, :fo].set(w.astype(compute_dtype))
        b_pad = jnp.zeros((1, op), dtype=jnp.float32)
        b_pad = b_pad.at[0, :fo].set(b.astype(jnp.float32))
        wb_padded.append((w_pad, b_pad))
        true_dims.append((fi, fo))

    return {
        "wb": wb_padded,
        "dims": true_dims,
        "compute_dtype": compute_dtype,
    }


# --------------------------------------------------------------------------
# Forward
# --------------------------------------------------------------------------
def relu_inner_network_forward(prepared, x, *, batch_tile: int = 512, out_dtype=None):
    """Forward pass matching _ReLUInnerNetwork.forward (every Linear except the
    last followed by ReLU), as a single fused Pallas kernel over batch tiles."""
    wb = prepared["wb"]
    dims = prepared["dims"]
    compute_dtype = prepared["compute_dtype"]
    num_linear = len(wb)

    B, Din = x.shape
    assert Din == dims[0][0], f"expected input dim {dims[0][0]}, got {Din}"
    din_p = wb[0][0].shape[0]
    dout = dims[-1][1]
    dout_p = wb[-1][0].shape[1]
    out_dtype = x.dtype if out_dtype is None else out_dtype
    out_itemsize = jnp.dtype(out_dtype).itemsize
    comp_itemsize = jnp.dtype(compute_dtype).itemsize

    vmem_cap, _, n_tc = _device_info()

    # ---- Output layout: skip lane padding when inflation would be >= 8x ----
    out_store = dout if (dout_p // max(dout, 1)) >= 8 else dout_p

    # ---- Batch tile selection ----------------------------------------------
    b8 = _round_up(B, _SUBLANE)
    tb = _round_up(min(batch_tile, b8), _SUBLANE)
    # >= 2 batch tiles on multi-TensorCore chips so "parallel" can shard them.
    if n_tc >= 2 and b8 >= 2 * _SUBLANE:
        tb = min(tb, _round_up(pl.cdiv(b8, n_tc), _SUBLANE))

    wb_dims = [(w.shape[0], w.shape[1]) for (w, _) in wb]
    max_op = max(op for _, op in wb_dims)

    def vmem_need(t, weight_bufs):
        x_bytes = 2 * t * din_p * 4                       # input block (dbl-buf, f32 worst case)
        o_bytes = 2 * t * out_store * out_itemsize        # output block (dbl-buf)
        w_bytes = sum(
            weight_bufs * ip * op * comp_itemsize + op * 4 for ip, op in wb_dims
        )
        act_bytes = 2 * t * max_op * 4                    # f32 intermediates headroom
        return x_bytes + o_bytes + w_bytes + act_bytes

    budget_cap = int(0.85 * vmem_cap)
    # TODO(synk): if the resident weights alone exceed VMEM (very large
    # latent_dim), switch the per-layer matmul to a K/N-tiled inner pipeline
    # (pltpu.emit_pipeline) instead of holding every layer's W in VMEM.
    while vmem_need(tb, 1) > budget_cap and tb > _SUBLANE:
        tb = max(_SUBLANE, _round_up(tb // 2, _SUBLANE))

    # ---- Input: pad only if actually required ------------------------------
    if (Din != din_p) or (B % tb != 0):
        b_pad = _round_up(B, tb)
        x_in = jnp.zeros((b_pad, din_p), dtype=compute_dtype)
        x_in = x_in.at[:B, :Din].set(x.astype(compute_dtype))
    else:
        b_pad = B
        x_in = x  # pass through untouched; cast happens in-kernel
    grid = (b_pad // tb,)

    # ---- Cost estimate / VMEM limit ----------------------------------------
    flops = 2 * b_pad * sum(ip * op for ip, op in wb_dims)
    bytes_accessed = (
        x_in.size * x_in.dtype.itemsize
        + sum(w.size * w.dtype.itemsize + b.size * b.dtype.itemsize for w, b in wb)
        + b_pad * out_store * out_itemsize
    )
    vmem_limit = int(min(vmem_cap, max(int(vmem_need(tb, 2) * 1.25), 16 << 20)))

    kernel = functools.partial(
        _fused_mlp_kernel,
        num_linear=num_linear,
        compute_dtype=compute_dtype,
        out_cols=out_store,
    )

    wb_flat = []
    for w, b in wb:
        wb_flat += [w, b]

    def _call(single_buffer_weights):
        wmode = (
            dict(pipeline_mode=pl.Buffered(1)) if single_buffer_weights else {}
        )
        in_specs = [pl.BlockSpec((tb, din_p), lambda i: (i, 0))]
        for ip, op in wb_dims:
            # Weights/biases stay resident across batch tiles; constant block
            # index, so single buffering suffices.
            in_specs.append(pl.BlockSpec((ip, op), lambda i: (0, 0), **wmode))
            in_specs.append(pl.BlockSpec((1, op), lambda i: (0, 0), **wmode))
        return pl.pallas_call(
            kernel,
            out_shape=jax.ShapeDtypeStruct((b_pad, out_store), out_dtype),
            grid_spec=pltpu.PrefetchScalarGridSpec(
                num_scalar_prefetch=0,
                grid=grid,
                in_specs=in_specs,
                out_specs=pl.BlockSpec((tb, out_store), lambda i: (i, 0)),
            ),
            compiler_params=pltpu.CompilerParams(
                dimension_semantics=("parallel",),
                vmem_limit_bytes=vmem_limit,
            ),
            cost_estimate=pl.CostEstimate(
                flops=flops, transcendentals=0, bytes_accessed=bytes_accessed
            ),
        )(x_in, *wb_flat)

    try:
        out_padded = _call(True)
    except Exception:
        # Fallback if this JAX build rejects Buffered(1) on resident blocks.
        out_padded = _call(False)

    # Slice away batch/feature padding.
    if out_store == dout:
        return out_padded[:B] if b_pad != B else out_padded
    return out_padded[:B, :dout]


# --------------------------------------------------------------------------
# Demo / self-check
# --------------------------------------------------------------------------
if __name__ == "__main__":
    # Small shapes consistent with the module's forward.
    input_dim = 16
    num_layers = 2   # -> Linear(16,32)+ReLU, Linear(32,32)+ReLU, Linear(32,8)
    latent_dim = 32
    output_dim = 8
    batch = 64

    key = jax.random.PRNGKey(0)
    key_params, key_x = jax.random.split(key)

    params = init_relu_inner_network_params(
        key_params, input_dim, num_layers, latent_dim, output_dim
    )
    x = jax.random.normal(key_x, (batch, input_dim), dtype=jnp.float32)

    prepared = prepare_relu_inner_network_params(params)
    out = relu_inner_network_forward(prepared, x)
    out = jax.block_until_ready(out)

    # Pure-JAX reference of the same computation (same bf16-operand / f32-acc
    # matmul precision as the kernel).
    ref = x
    for li, (w, b) in enumerate(params):
        ref = jnp.dot(
            ref.astype(jnp.bfloat16),
            w.astype(jnp.bfloat16),
            preferred_element_type=jnp.float32,
        ) + b.astype(jnp.float32)
        if li != len(params) - 1:
            ref = jnp.maximum(ref, 0.0)

    assert out.shape == (batch, output_dim), out.shape
    assert jnp.allclose(out.astype(jnp.float32), ref, atol=1e-2, rtol=1e-2), (
        float(jnp.max(jnp.abs(out.astype(jnp.float32) - ref)))
    )

    print("KERNEL_OK")
</pallas_src>

<mosaic_0001>
module attributes {stable_mosaic.version = 11 : i64} {
  func.func @_fused_mlp_kernel(%arg0: i32, %arg1: memref<64x128xbf16, #tpu.memory_space<vmem>>, %arg2: memref<128x128xbf16, #tpu.memory_space<vmem>>, %arg3: memref<1x128xf32, #tpu.memory_space<vmem>>, %arg4: memref<128x128xbf16, #tpu.memory_space<vmem>>, %arg5: memref<1x128xf32, #tpu.memory_space<vmem>>, %arg6: memref<128x128xbf16, #tpu.memory_space<vmem>>, %arg7: memref<1x128xf32, #tpu.memory_space<vmem>>, %arg8: memref<64x8xf32, #tpu.memory_space<vmem>>) attributes {dimension_semantics = [#tpu.dimension_semantics<parallel>], iteration_bounds = array<i64: 1>, scalar_prefetch = 0 : i64, scratch_operands = 0 : i64, tpu.core_type = #tpu.core_type<tc>, window_params = [{transform_indices = @transform_0, window_bounds = array<i64: 64, 128>}, {pipeline_mode = #tpu.pipeline_mode<synchronous>, transform_indices = @transform_1, window_bounds = array<i64: 128, 128>}, {pipeline_mode = #tpu.pipeline_mode<synchronous>, transform_indices = @transform_2, window_bounds = array<i64: 1, 128>}, {pipeline_mode = #tpu.pipeline_mode<synchronous>, transform_indices = @transform_3, window_bounds = array<i64: 128, 128>}, {pipeline_mode = #tpu.pipeline_mode<synchronous>, transform_indices = @transform_4, window_bounds = array<i64: 1, 128>}, {pipeline_mode = #tpu.pipeline_mode<synchronous>, transform_indices = @transform_5, window_bounds = array<i64: 128, 128>}, {pipeline_mode = #tpu.pipeline_mode<synchronous>, transform_indices = @transform_6, window_bounds = array<i64: 1, 128>}, {transform_indices = @transform_7, window_bounds = array<i64: 64, 8>}]} {
    %c0 = arith.constant 0 : index
    %c0_0 = arith.constant 0 : index
    %0 = vector.load %arg1[%c0, %c0_0] : memref<64x128xbf16, #tpu.memory_space<vmem>>, vector<64x128xbf16>
    %c0_1 = arith.constant 0 : index
    %c0_2 = arith.constant 0 : index
    %1 = vector.load %arg2[%c0_1, %c0_2] : memref<128x128xbf16, #tpu.memory_space<vmem>>, vector<128x128xbf16>
    %cst = arith.constant dense<0.000000e+00> : vector<64x128xf32>
    %2 = tpu.matmul %0, %1, %cst {dimension_numbers = #tpu.dot_dimension_numbers<[1], [0], [0], [1], [0, 0, 1, 1], [], []>} : vector<64x128xbf16>, vector<128x128xbf16>, vector<64x128xf32> -> vector<64x128xf32>
    %c0_3 = arith.constant 0 : index
    %c0_4 = arith.constant 0 : index
    %3 = vector.load %arg3[%c0_3, %c0_4] : memref<1x128xf32, #tpu.memory_space<vmem>>, vector<1x128xf32>
    %4 = vector.broadcast %3 : vector<1x128xf32> to vector<64x128xf32>
    %5 = arith.addf %2, %4 : vector<64x128xf32>
    %cst_5 = arith.constant 0.000000e+00 : f32
    %6 = vector.broadcast %cst_5 : f32 to vector<64x128xf32>
    %7 = arith.maximumf %5, %6 : vector<64x128xf32>
    %8 = arith.truncf %7 : vector<64x128xf32> to vector<64x128xbf16>
    %c0_6 = arith.constant 0 : index
    %c0_7 = arith.constant 0 : index
    %9 = vector.load %arg4[%c0_6, %c0_7] : memref<128x128xbf16, #tpu.memory_space<vmem>>, vector<128x128xbf16>
    %cst_8 = arith.constant dense<0.000000e+00> : vector<64x128xf32>
    %10 = tpu.matmul %8, %9, %cst_8 {dimension_numbers = #tpu.dot_dimension_numbers<[1], [0], [0], [1], [0, 0, 1, 1], [], []>} : vector<64x128xbf16>, vector<128x128xbf16>, vector<64x128xf32> -> vector<64x128xf32>
    %c0_9 = arith.constant 0 : index
    %c0_10 = arith.constant 0 : index
    %11 = vector.load %arg5[%c0_9, %c0_10] : memref<1x128xf32, #tpu.memory_space<vmem>>, vector<1x128xf32>
    %12 = vector.broadcast %11 : vector<1x128xf32> to vector<64x128xf32>
    %13 = arith.addf %10, %12 : vector<64x128xf32>
    %cst_11 = arith.constant 0.000000e+00 : f32
    %14 = vector.broadcast %cst_11 : f32 to vector<64x128xf32>
    %15 = arith.maximumf %13, %14 : vector<64x128xf32>
    %16 = arith.truncf %15 : vector<64x128xf32> to vector<64x128xbf16>
    %c0_12 = arith.constant 0 : index
    %c0_13 = arith.constant 0 : index
    %17 = vector.load %arg6[%c0_12, %c0_13] : memref<128x128xbf16, #tpu.memory_space<vmem>>, vector<128x128xbf16>
    %cst_14 = arith.constant dense<0.000000e+00> : vector<64x128xf32>
    %18 = tpu.matmul %16, %17, %cst_14 {dimension_numbers = #tpu.dot_dimension_numbers<[1], [0], [0], [1], [0, 0, 1, 1], [], []>} : vector<64x128xbf16>, vector<128x128xbf16>, vector<64x128xf32> -> vector<64x128xf32>
    %c0_15 = arith.constant 0 : index
    %c0_16 = arith.constant 0 : index
    %19 = vector.load %arg7[%c0_15, %c0_16] : memref<1x128xf32, #tpu.memory_space<vmem>>, vector<1x128xf32>
    %20 = vector.broadcast %19 : vector<1x128xf32> to vector<64x128xf32>
    %21 = arith.addf %18, %20 : vector<64x128xf32>
    %22 = vector.extract_strided_slice %21 {offsets = [0, 0], sizes = [64, 8], strides = [1, 1]} : vector<64x128xf32> to vector<64x8xf32>
    %c0_17 = arith.constant 0 : index
    %c0_18 = arith.constant 0 : index
    %23 = vector.load %arg8[%c0_17, %c0_18] : memref<64x8xf32, #tpu.memory_space<vmem>>, vector<64x8xf32>
    tpu.vector_store %arg8[%c0_17, %c0_18], %22 {strides = array<i32>} : memref<64x8xf32, #tpu.memory_space<vmem>>, vector<64x8xf32>,
    return
  }
  func.func @transform_0(%arg0: i32) -> (i32, i32) {
    %c0_i32 = arith.constant 0 : i32
    %c0_i32_0 = arith.constant 0 : i32
    return %arg0, %c0_i32 : i32, i32
  }
  func.func @transform_1(%arg0: i32) -> (i32, i32) {
    %c0_i32 = arith.constant 0 : i32
    %c0_i32_0 = arith.constant 0 : i32
    %c0_i32_1 = arith.constant 0 : i32
    return %c0_i32, %c0_i32_0 : i32, i32
  }
  func.func @transform_2(%arg0: i32) -> (i32, i32) {
    %c0_i32 = arith.constant 0 : i32
    %c0_i32_0 = arith.constant 0 : i32
    %c0_i32_1 = arith.constant 0 : i32
    return %c0_i32, %c0_i32_0 : i32, i32
  }
  func.func @transform_3(%arg0: i32) -> (i32, i32) {
    %c0_i32 = arith.constant 0 : i32
    %c0_i32_0 = arith.constant 0 : i32
    %c0_i32_1 = arith.constant 0 : i32
    return %c0_i32, %c0_i32_0 : i32, i32
  }
  func.func @transform_4(%arg0: i32) -> (i32, i32) {
    %c0_i32 = arith.constant 0 : i32
    %c0_i32_0 = arith.constant 0 : i32
    %c0_i32_1 = arith.constant 0 : i32
    return %c0_i32, %c0_i32_0 : i32, i32
  }
  func.func @transform_5(%arg0: i32) -> (i32, i32) {
    %c0_i32 = arith.constant 0 : i32
    %c0_i32_0 = arith.constant 0 : i32
    %c0_i32_1 = arith.constant 0 : i32
    return %c0_i32, %c0_i32_0 : i32, i32
  }
  func.func @transform_6(%arg0: i32) -> (i32, i32) {
    %c0_i32 = arith.constant 0 : i32
    %c0_i32_0 = arith.constant 0 : i32
    %c0_i32_1 = arith.constant 0 : i32
    return %c0_i32, %c0_i32_0 : i32, i32
  }
  func.func @transform_7(%arg0: i32) -> (i32, i32) {
    %c0_i32 = arith.constant 0 : i32
    %c0_i32_0 = arith.constant 0 : i32
    return %arg0, %c0_i32 : i32, i32
  }
}

module attributes {stable_mosaic.version = 11 : i64} {
  func.func @_fused_mlp_kernel(%arg0: i32, %arg1: memref<64x128xbf16, #tpu.memory_space<vmem>>, %arg2: memref<128x128xbf16, #tpu.memory_space<vmem>>, %arg3: memref<1x128xf32, #tpu.memory_space<vmem>>, %arg4: memref<128x128xbf16, #tpu.memory_space<vmem>>, %arg5: memref<1x128xf32, #tpu.memory_space<vmem>>, %arg6: memref<128x128xbf16, #tpu.memory_space<vmem>>, %arg7: memref<1x128xf32, #tpu.memory_space<vmem>>, %arg8: memref<64x8xf32, #tpu.memory_space<vmem>>) attributes {dimension_semantics = [#tpu.dimension_semantics<parallel>], iteration_bounds = array<i64: 1>, scalar_prefetch = 0 : i64, scratch_operands = 0 : i64, tpu.core_type = #tpu.core_type<tc>, window_params = [{transform_indices = @transform_0, window_bounds = array<i64: 64, 128>}, {pipeline_mode = #tpu.pipeline_mode<synchronous>, transform_indices = @transform_1, window_bounds = array<i64: 128, 128>}, {pipeline_mode = #tpu.pipeline_mode<synchronous>, transform_indices = @transform_2, window_bounds = array<i64: 1, 128>}, {pipeline_mode = #tpu.pipeline_mode<synchronous>, transform_indices = @transform_3, window_bounds = array<i64: 128, 128>}, {pipeline_mode = #tpu.pipeline_mode<synchronous>, transform_indices = @transform_4, window_bounds = array<i64: 1, 128>}, {pipeline_mode = #tpu.pipeline_mode<synchronous>, transform_indices = @transform_5, window_bounds = array<i64: 128, 128>}, {pipeline_mode = #tpu.pipeline_mode<synchronous>, transform_indices = @transform_6, window_bounds = array<i64: 1, 128>}, {transform_indices = @transform_7, window_bounds = array<i64: 64, 8>}]} {
    %c0 = arith.constant 0 : index
    %c0_0 = arith.constant 0 : index
    %0 = vector.load %arg1[%c0, %c0_0] : memref<64x128xbf16, #tpu.memory_space<vmem>>, vector<64x128xbf16>
    %c0_1 = arith.constant 0 : index
    %c0_2 = arith.constant 0 : index
    %1 = vector.load %arg2[%c0_1, %c0_2] : memref<128x128xbf16, #tpu.memory_space<vmem>>, vector<128x128xbf16>
    %cst = arith.constant dense<0.000000e+00> : vector<64x128xf32>
    %2 = tpu.matmul %0, %1, %cst {dimension_numbers = #tpu.dot_dimension_numbers<[1], [0], [0], [1], [0, 0, 1, 1], [], []>} : vector<64x128xbf16>, vector<128x128xbf16>, vector<64x128xf32> -> vector<64x128xf32>
    %c0_3 = arith.constant 0 : index
    %c0_4 = arith.constant 0 : index
    %3 = vector.load %arg3[%c0_3, %c0_4] : memref<1x128xf32, #tpu.memory_space<vmem>>, vector<1x128xf32>
    %4 = vector.broadcast %3 : vector<1x128xf32> to vector<64x128xf32>
    %5 = arith.addf %2, %4 : vector<64x128xf32>
    %cst_5 = arith.constant 0.000000e+00 : f32
    %6 = vector.broadcast %cst_5 : f32 to vector<64x128xf32>
    %7 = arith.maximumf %5, %6 : vector<64x128xf32>
    %8 = arith.truncf %7 : vector<64x128xf32> to vector<64x128xbf16>
    %c0_6 = arith.constant 0 : index
    %c0_7 = arith.constant 0 : index
    %9 = vector.load %arg4[%c0_6, %c0_7] : memref<128x128xbf16, #tpu.memory_space<vmem>>, vector<128x128xbf16>
    %cst_8 = arith.constant dense<0.000000e+00> : vector<64x128xf32>
    %10 = tpu.matmul %8, %9, %cst_8 {dimension_numbers = #tpu.dot_dimension_numbers<[1], [0], [0], [1], [0, 0, 1, 1], [], []>} : vector<64x128xbf16>, vector<128x128xbf16>, vector<64x128xf32> -> vector<64x128xf32>
    %c0_9 = arith.constant 0 : index
    %c0_10 = arith.constant 0 : index
    %11 = vector.load %arg5[%c0_9, %c0_10] : memref<1x128xf32, #tpu.memory_space<vmem>>, vector<1x128xf32>
    %12 = vector.broadcast %11 : vector<1x128xf32> to vector<64x128xf32>
    %13 = arith.addf %10, %12 : vector<64x128xf32>
    %cst_11 = arith.constant 0.000000e+00 : f32
    %14 = vector.broadcast %cst_11 : f32 to vector<64x128xf32>
    %15 = arith.maximumf %13, %14 : vector<64x128xf32>
    %16 = arith.truncf %15 : vector<64x128xf32> to vector<64x128xbf16>
    %c0_12 = arith.constant 0 : index
    %c0_13 = arith.constant 0 : index
    %17 = vector.load %arg6[%c0_12, %c0_13] : memref<128x128xbf16, #tpu.memory_space<vmem>>, vector<128x128xbf16>
    %cst_14 = arith.constant dense<0.000000e+00> : vector<64x128xf32>
    %18 = tpu.matmul %16, %17, %cst_14 {dimension_numbers = #tpu.dot_dimension_numbers<[1], [0], [0], [1], [0, 0, 1, 1], [], []>} : vector<64x128xbf16>, vector<128x128xbf16>, vector<64x128xf32> -> vector<64x128xf32>
    %c0_15 = arith.constant 0 : index
    %c0_16 = arith.constant 0 : index
    %19 = vector.load %arg7[%c0_15, %c0_16] : memref<1x128xf32, #tpu.memory_space<vmem>>, vector<1x128xf32>
    %20 = vector.broadcast %19 : vector<1x128xf32> to vector<64x128xf32>
    %21 = arith.addf %18, %20 : vector<64x128xf32>
    %22 = vector.extract_strided_slice %21 {offsets = [0, 0], sizes = [64, 8], strides = [1, 1]} : vector<64x128xf32> to vector<64x8xf32>
    %c0_17 = arith.constant 0 : index
    %c0_18 = arith.constant 0 : index
    %23 = vector.load %arg8[%c0_17, %c0_18] : memref<64x8xf32, #tpu.memory_space<vmem>>, vector<64x8xf32>
    tpu.vector_store %arg8[%c0_17, %c0_18], %22 {strides = array<i32>} : memref<64x8xf32, #tpu.memory_space<vmem>>, vector<64x8xf32>,
    return
  }
  func.func @transform_0(%arg0: i32) -> (i32, i32) {
    %c0_i32 = arith.constant 0 : i32
    %c0_i32_0 = arith.constant 0 : i32
    return %arg0, %c0_i32 : i32, i32
  }
  func.func @transform_1(%arg0: i32) -> (i32, i32) {
    %c0_i32 = arith.constant 0 : i32
    %c0_i32_0 = arith.constant 0 : i32
    %c0_i32_1 = arith.constant 0 : i32
    return %c0_i32, %c0_i32_0 : i32, i32
  }
  func.func @transform_2(%arg0: i32) -> (i32, i32) {
    %c0_i32 = arith.constant 0 : i32
    %c0_i32_0 = arith.constant 0 : i32
    %c0_i32_1 = arith.constant 0 : i32
    return %c0_i32, %c0_i32_0 : i32, i32
  }
  func.func @transform_3(%arg0: i32) -> (i32, i32) {
    %c0_i32 = arith.constant 0 : i32
    %c0_i32_0 = arith.constant 0 : i32
    %c0_i32_1 = arith.constant 0 : i32
    return %c0_i32, %c0_i32_0 : i32, i32
  }
  func.func @transform_4(%arg0: i32) -> (i32, i32) {
    %c0_i32 = arith.constant 0 : i32
    %c0_i32_0 = arith.constant 0 : i32
    %c0_i32_1 = arith.constant 0 : i32
    return %c0_i32, %c0_i32_0 : i32, i32
  }
  func.func @transform_5(%arg0: i32) -> (i32, i32) {
    %c0_i32 = arith.constant 0 : i32
    %c0_i32_0 = arith.constant 0 : i32
    %c0_i32_1 = arith.constant 0 : i32
    return %c0_i32, %c0_i32_0 : i32, i32
  }
  func.func @transform_6(%arg0: i32) -> (i32, i32) {
    %c0_i32 = arith.constant 0 : i32
    %c0_i32_0 = arith.constant 0 : i32
    %c0_i32_1 = arith.constant 0 : i32
    return %c0_i32, %c0_i32_0 : i32, i32
  }
  func.func @transform_7(%arg0: i32) -> (i32, i32) {
    %c0_i32 = arith.constant 0 : i32
    %c0_i32_0 = arith.constant 0 : i32
    return %arg0, %c0_i32 : i32, i32
  }
}

</mosaic_0001>

<bundles_post_ra>
// kernel: tpu_custom_call.1
= control target key start
LH: loop header
LB: loop body
LE: loop exit
PB: predicated region body
PF: predicated region fallthrough
CT: control target
= control target key end

     0   :  { %12 = vsyncpa [#allocation3], 0  ;;  %s1006_s0 = inlined_call_operand.hbm [shape: bf16[64,128], index: 0, kind: input, shape index: {}]   ;;  %s1007_s1 = inlined_call_operand.hbm [shape: bf16[128,128], index: 1, kind: input, shape index: {}]   ;;  %s1008_s2 = inlined_call_operand.vmem [shape: f32[1,128], index: 2, kind: input, shape index: {}]   ;;  %s1009_s3 = inlined_call_operand.hbm [shape: bf16[128,128], index: 3, kind: input, shape index: {}]   ;;  %s1010_s4 = inlined_call_operand.vmem [shape: f32[1,128], index: 4, kind: input, shape index: {}]   ;;  %s1011_s5 = inlined_call_operand.hbm [shape: bf16[128,128], index: 5, kind: input, shape index: {}]   ;;  %s1012_s6 = inlined_call_operand.vmem [shape: f32[1,128], index: 6, kind: input, shape index: {}]   ;;  %s1013_s7 = inlined_call_operand.vmem [shape: f32[64,8], index: 7, kind: output, shape index: {}]  }
   0x1   :  { %13 = vsyncpa [#allocation5], 0 }
   0x2   :  { %14 = vsyncpa [#allocation8], 0  ;;  %s845_s24 = smov [#allocation4]   ;;  %s846_s26 = smov [#allocation2]  }
   0x3   :  { %s32_s25 = sshll.u32 %s845_s24, 4  ;;  %s20_s27 = sshll.u32 %s846_s26, 4  ;;  %s33_s25 = int_to_ptr.vmem [resolvable:$true] %s32_s25  ;;  %s891_s27 = int_to_ptr.vmem [resolvable:$true] %s20_s27 }
   0x4   :  { %s751_s30 = scalar_lea.hbm %s1007_s1, 1024 }
   0x5   :  { %p752_p0 = scmp.ne.s32.totalorder %s1007_s1, %s751_s30  ;;  %p755_p1 = scmp.lt.u32.totalorder %s751_s30, %s1007_s1 }
   0x7   :  { %p757_p2 = pnand %p755_p1, %p752_p0 }
   0x9   :  { %760 = shalt.err (!%p757_p2)
}
   0xa   :  { %s761_s12 = scalar_lea.vmem %s33_s25, 1024  ;;  %p766_p4 = scmp.lt.s32.totalorder %s33_s25, %s33_s25 }
   0xb   :  { %p762_p3 = scmp.ne.s32.totalorder %s33_s25, %s761_s12  ;;  %p767_p5 = scmp.lt.s32.totalorder %s761_s12, %s761_s12 }
   0xd   :  { %p768_p6 = por %p767_p5, %p766_p4 }
   0xf   :  { %p769_p7 = pnand %p768_p6, %p762_p3 }
  0x11   :  { %772 = shalt.err (!%p769_p7)
}
  0x12   :  { %s847_s13 = smov 64   ;;  %s848_s14 = smov 4  }
  0x13   :  { %38 = dma.hbm_to_vmem [thread:$0]  %s1007_s1, 1024, %s33_s25, [#allocation5], %s847_s13, %s847_s13, %s848_s14  }
  0x14   :  { %s773_s19 = scalar_lea.hbm %s1006_s0, 512 }
  0x15   :  { %p774_p8 = scmp.ne.s32.totalorder %s1006_s0, %s773_s19  ;;  %p777_p9 = scmp.lt.u32.totalorder %s773_s19, %s1006_s0 }
  0x17   :  { %p779_p10 = pnand %p777_p9, %p774_p8 }
  0x19   :  { %782 = shalt.err (!%p779_p10)
}
  0x1a   :  { %s783_s24 = scalar_lea.vmem %s891_s27, 512  ;;  %p788_p12 = scmp.lt.s32.totalorder %s891_s27, %s891_s27 }
  0x1b   :  { %p784_p11 = scmp.ne.s32.totalorder %s891_s27, %s783_s24  ;;  %p789_p13 = scmp.lt.s32.totalorder %s783_s24, %s783_s24 }
  0x1d   :  { %p790_p0 = por %p789_p13, %p788_p12 }
  0x1f   :  { %p791_p1 = pnand %p790_p0, %p784_p11 }
  0x21   :  { %794 = shalt.err (!%p791_p1)
}
  0x22   :  { %26 = dma.hbm_to_vmem [thread:$0]  %s1006_s0, 512, %s891_s27, [#allocation3], %s847_s13, %s847_s13, %s848_s14  }
  0x23   :  { %s849_s26 = smov [#allocation6]   ;;  %s850_s29 = smov [#allocation7]  }
  0x24   :  { %s46_s28 = sshll.u32 %s849_s26, 4  ;;  %s60_s30 = sshll.u32 %s850_s29, 4  ;;  %s47_s28 = int_to_ptr.vmem [resolvable:$true] %s46_s28  ;;  %s928_s30 = int_to_ptr.vmem [resolvable:$true] %s60_s30 }
  0x25   :  { %s795_s10 = scalar_lea.hbm %s1009_s3, 1024 }
  0x26   :  { %p796_p2 = scmp.ne.s32.totalorder %s1009_s3, %s795_s10  ;;  %p799_p3 = scmp.lt.u32.totalorder %s795_s10, %s1009_s3 }
  0x28   :  { %p801_p4 = pnand %p799_p3, %p796_p2 }
  0x2a   :  { %804 = shalt.err (!%p801_p4)
}
  0x2b   :  { %s805_s0 = scalar_lea.vmem %s47_s28, 1024  ;;  %p810_p6 = scmp.lt.s32.totalorder %s47_s28, %s47_s28 }
  0x2c   :  { %p806_p5 = scmp.ne.s32.totalorder %s47_s28, %s805_s0  ;;  %p811_p7 = scmp.lt.s32.totalorder %s805_s0, %s805_s0 }
  0x2e   :  { %p812_p8 = por %p811_p7, %p810_p6 }
  0x30   :  { %p813_p9 = pnand %p812_p8, %p806_p5 }
  0x32   :  { %816 = shalt.err (!%p813_p9)
}
  0x33   :  { %52 = dma.hbm_to_vmem [thread:$0]  %s1009_s3, 1024, %s47_s28, [#allocation5], %s847_s13, %s847_s13, %s848_s14  }
  0x34   :  { %s817_s20 = scalar_lea.hbm %s1011_s5, 1024 }
  0x35   :  { %p818_p10 = scmp.ne.s32.totalorder %s1011_s5, %s817_s20  ;;  %p821_p11 = scmp.lt.u32.totalorder %s817_s20, %s1011_s5 }
  0x37   :  { %p823_p12 = pnand %p821_p11, %p818_p10 }
  0x39   :  { %826 = shalt.err (!%p823_p12)
}
  0x3a   :  { %s827_s1 = scalar_lea.vmem %s928_s30, 1024  ;;  %p832_p0 = scmp.lt.s32.totalorder %s928_s30, %s928_s30 }
  0x3b   :  { %p828_p13 = scmp.ne.s32.totalorder %s928_s30, %s827_s1  ;;  %p833_p1 = scmp.lt.s32.totalorder %s827_s1, %s827_s1 }
  0x3d   :  { %p834_p2 = por %p833_p1, %p832_p0 }
  0x3f   :  { %p835_p3 = pnand %p834_p2, %p828_p13 }
  0x41   :  { %838 = shalt.err (!%p835_p3)
}
  0x42   :  { %66 = dma.hbm_to_vmem [thread:$0]  %s1011_s5, 1024, %s928_s30, [#allocation8], %s847_s13, %s847_s13, %s848_s14  }
  0x43   :  { %839 = dma.done.wait [#allocation3], 512  }
  0x44   :  { %840 = vsyncadd [#allocation3], 4294966784 }
  0x45   :  { %841 = dma.done.wait [#allocation5], 2048  }
  0x46   :  { %842 = vsyncadd [#allocation5], 4294965248 }
  0x47   :  { %843 = dma.done.wait [#allocation8], 1024  }
  0x48   :  { %844 = vsyncadd [#allocation8], 4294966272  ;;  %v723_v0 = vld [vmem:[#allocation4] sm:$0xff]   ;;  %v724_v1 = vld [vmem:[#allocation4 + $0x8] sm:$0xff]   ;;  %vm546_vm0 = vcmask 64512  }
  0x49   :  { %629 = vmatprep.subr.bf16.mxu0 %v723_v0  ;;  %v725_v2 = vld [vmem:[#allocation4 + $0x10] sm:$0xff]   ;;  %v726_v3 = vld [vmem:[#allocation4 + $0x18] sm:$0xff]   ;;  %v731_v4 = vld [vmem:[#allocation2] sm:$0xff]  }
  0x4a   :  { %630 = vmatpush3.bf16.msra.mxu0 %v723_v0  ;;  %645 = vmatprep.mubr.bf16.mxu0 %v731_v4  ;;  %v727_v5 = vld [vmem:[#allocation4 + $0x20] sm:$0xff]   ;;  %v736_v7 = vld [vmem:[#allocation6 + $0x8] sm:$0xff]   ;;  %v737_v9 = vld [vmem:[#allocation6 + $0x10] sm:$0xff]  }
  0x4b   :  { %631 = vmatprep.subr.bf16.mxu0 %v724_v1  ;;  %v735_v6 = vld [vmem:[#allocation6] sm:$0xff]   ;;  %v728_v8 = vld [vmem:[#allocation4 + $0x28] sm:$0xff]   ;;  %v729_v10 = vld [vmem:[#allocation4 + $0x30] sm:$0xff]  }
  0x4c   :  { %653 = vmatprep.subr.bf16.mxu1 %v735_v6  ;;  %v738_v11 = vld [vmem:[#allocation6 + $0x18] sm:$0xff]   ;;  %v739_v13 = vld [vmem:[#allocation6 + $0x20] sm:$0xff]   ;;  %v740_v14 = vld [vmem:[#allocation6 + $0x28] sm:$0xff]  }
  0x4d   :  { %654 = vmatpush3.bf16.msra.mxu1 %v735_v6  ;;  %v730_v12 = vld [vmem:[#allocation4 + $0x38] sm:$0xff]   ;;  %v732_v15 = vld [vmem:[#allocation2 + $0x8] sm:$0xff]   ;;  %v733_v16 = vld [vmem:[#allocation2 + $0x10] sm:$0xff]  }
  0x4e   :  { %632 = vmatpush3.bf16.msra.mxu0 %v724_v1  ;;  %655 = vmatprep.subr.bf16.mxu1 %v736_v7  ;;  %v734_v17 = vld [vmem:[#allocation2 + $0x18] sm:$0xff]   ;;  %v741_v18 = vld [vmem:[#allocation6 + $0x30] sm:$0xff]   ;;  %v743_v20 = vld [vmem:[#allocation7] sm:$0xff]  }
  0x4f   :  { %633 = vmatprep.subr.bf16.mxu0 %v725_v2  ;;  %v742_v19 = vld [vmem:[#allocation6 + $0x38] sm:$0xff]   ;;  %v744_v21 = vld [vmem:[#allocation7 + $0x8] sm:$0xff]   ;;  %v745_v22 = vld [vmem:[#allocation7 + $0x10] sm:$0xff]  }
  0x50   :  { %v746_v23 = vld [vmem:[#allocation7 + $0x18] sm:$0xff]   ;;  %v747_v24 = vld [vmem:[#allocation7 + $0x20] sm:$0xff]   ;;  %v748_v25 = vld [vmem:[#allocation7 + $0x28] sm:$0xff]  }
  0x51   :  { %656 = vmatpush3.bf16.msra.mxu1 %v736_v7  ;;  %v562_v26 = vld [vmem:[%s1008_s2] ss:$0 sm:$0xff]  ;;  %v749_v55 = vld [vmem:[#allocation7 + $0x30] sm:$0xff]   ;;  %v750_v56 = vld [vmem:[#allocation7 + $0x38] sm:$0xff]  }
  0x52   :  { %634 = vmatpush3.bf16.msra.mxu0 %v725_v2  ;;  %657 = vmatprep.subr.bf16.mxu1 %v737_v9  ;;  %v575_v57 = vld [vmem:[%s1010_s4] ss:$0 sm:$0xff] }
  0x53   :  { %635 = vmatprep.subr.bf16.mxu0 %v726_v3 }
  0x55   :  { %658 = vmatpush3.bf16.msra.mxu1 %v737_v9 }
  0x56   :  { %636 = vmatpush3.bf16.msra.mxu0 %v726_v3  ;;  %659 = vmatprep.subr.bf16.mxu1 %v738_v11 }
  0x57   :  { %637 = vmatprep.subr.bf16.mxu0 %v727_v5 }
  0x59   :  { %660 = vmatpush3.bf16.msra.mxu1 %v738_v11 }
  0x5a   :  { %638 = vmatpush3.bf16.msra.mxu0 %v727_v5  ;;  %661 = vmatprep.subr.bf16.mxu1 %v739_v13 }
  0x5b   :  { %639 = vmatprep.subr.bf16.mxu0 %v728_v8 }
  0x5d   :  { %662 = vmatpush3.bf16.msra.mxu1 %v739_v13 }
  0x5e   :  { %640 = vmatpush3.bf16.msra.mxu0 %v728_v8  ;;  %663 = vmatprep.subr.bf16.mxu1 %v740_v14 }
  0x5f   :  { %641 = vmatprep.subr.bf16.mxu0 %v729_v10 }
  0x61   :  { %664 = vmatpush3.bf16.msra.mxu1 %v740_v14 }
  0x62   :  { %642 = vmatpush3.bf16.msra.mxu0 %v729_v10  ;;  %665 = vmatprep.subr.bf16.mxu1 %v741_v18 }
  0x63   :  { %643 = vmatprep.subr.bf16.mxu0 %v730_v12 }
  0x65   :  { %666 = vmatpush3.bf16.msra.mxu1 %v741_v18 }
  0x66   :  { %644 = vmatpush3.bf16.msra.mxu0 %v730_v12  ;;  %667 = vmatprep.subr.bf16.mxu1 %v742_v19 }
  0x67   :  { %677 = vmatprep.subr.bf16.mxu0 %v743_v20 }
  0x69   :  { %646 = vmatmul.mubr.bf16.vlgmr.msra.gmra.mrb[0].mxu0 %v732_v15  ;;  %668 = vmatpush3.bf16.msra.mxu1 %v742_v19 }
  0x6a   :  { %649 = vmatprep.mubr.bf16.mxu0 %v733_v16  ;;  %701 = vmatprep.subr.bf16.mxu1 %v743_v20 }
  0x6b   :  { %678 = vmatpush3.bf16.msra.mxu0 %v743_v20 }
  0x6c   :  { %679 = vmatprep.subr.bf16.mxu0 %v744_v21 }
  0x6f   :  { %680 = vmatpush3.bf16.msra.mxu0 %v744_v21 }
  0x70   :  { %681 = vmatprep.subr.bf16.mxu0 %v745_v22 }
  0x71   :  { %650 = vmatmul.mubr.bf16.gmra.mrb[4].mxu0 %v734_v17 }
  0x73   :  { %682 = vmatpush3.bf16.msra.mxu0 %v745_v22 }
  0x74   :  { %683 = vmatprep.subr.bf16.mxu0 %v746_v23 }
  0x77   :  { %684 = vmatpush3.bf16.msra.mxu0 %v746_v23 }
  0x78   :  { %685 = vmatprep.subr.bf16.mxu0 %v747_v24 }
  0x7b   :  { %686 = vmatpush3.bf16.msra.mxu0 %v747_v24 }
  0x7c   :  { %687 = vmatprep.subr.bf16.mxu0 %v748_v25 }
  0x7f   :  { %688 = vmatpush3.bf16.msra.mxu0 %v748_v25 }
  0x80   :  { %689 = vmatprep.subr.bf16.mxu0 %v749_v55 }
  0x83   :  { %690 = vmatpush3.bf16.msra.mxu0 %v749_v55 }
  0x84   :  { %691 = vmatprep.subr.bf16.mxu0 %v750_v56 }
  0x87   :  { %692 = vmatpush3.bf16.msra.mxu0 %v750_v56 }
 0x13c   :  { %v647_v27 = vpop.f32.mrb[0].mxu0 }
 0x13d   :  { %v228_v28 = vadd.f32 %v647_v27, %v562_v26  ;;  %v219_v29 = vpop.f32.mrb[1].mxu0 }
 0x13e   :  { %v220_v30 = vadd.f32 %v562_v26, %v219_v29  ;;  %v648_v31 = vpop.f32.mrb[2].mxu0 }
 0x13f   :  { %v231_v32 = vadd.f32 %v648_v31, %v562_v26  ;;  %v222_v33 = vpop.f32.mrb[3].mxu0  ;;  %v252_v35 = vmax.f32 %v228_v28, 0.0 }
 0x140   :  { %v223_v34 = vadd.f32 %v562_v26, %v222_v33  ;;  %v250_v37 = vmax.f32 %v220_v30, 0.0 }
 0x141   :  { %v253_v36 = vmax.f32 %v231_v32, 0.0 }
 0x142   :  { %v251_v38 = vmax.f32 %v223_v34, 0.0 }
 0x143   :  { %v259_v39 = vpack.c.bf16 %v253_v36, %v252_v35 }
 0x144   :  { %v651_v40 = vpop.f32.mrb[4].mxu0  ;;  %v258_v41 = vpack.c.bf16 %v251_v38, %v250_v37 }
 0x145   :  { %v244_v42 = vadd.f32 %v651_v40, %v562_v26  ;;  %v235_v43 = vpop.f32.mrb[5].mxu0 }
 0x146   :  { %v236_v44 = vadd.f32 %v562_v26, %v235_v43  ;;  %v652_v45 = vpop.f32.mrb[6].mxu0  ;;  %669 = vmatprep.mubr.bf16.mxu1 %v258_v41 }
 0x147   :  { %v247_v46 = vadd.f32 %v652_v45, %v562_v26  ;;  %v238_v47 = vpop.f32.mrb[7].mxu0  ;;  %670 = vmatmul.mubr.bf16.vlgmr.msra.gmra.mrb[0].mxu1 %v259_v39  ;;  %v256_v49 = vmax.f32 %v244_v42, 0.0 }
 0x148   :  { %v239_v48 = vadd.f32 %v562_v26, %v238_v47  ;;  %709 = vmatpush3.bf16.msra.mxu1 %v743_v20  ;;  %v254_v51 = vmax.f32 %v236_v44, 0.0 }
 0x149   :  { %v257_v50 = vmax.f32 %v247_v46, 0.0  ;;  %702 = vmatprep.subr.bf16.mxu1 %v744_v21 }
 0x14a   :  { %v255_v52 = vmax.f32 %v239_v48, 0.0 }
 0x14b   :  { %v261_v53 = vpack.c.bf16 %v257_v50, %v256_v49 }
 0x14c   :  { %v260_v54 = vpack.c.bf16 %v255_v52, %v254_v51  ;;  %710 = vmatpush3.bf16.msra.mxu1 %v744_v21 }
 0x14d   :  { %703 = vmatprep.subr.bf16.mxu1 %v745_v22 }
 0x14e   :  { %673 = vmatprep.mubr.bf16.mxu1 %v260_v54 }
 0x14f   :  { %674 = vmatmul.mubr.bf16.gmra.mrb[4].mxu1 %v261_v53 }
 0x150   :  { %711 = vmatpush3.bf16.msra.mxu1 %v745_v22  ;;  %v584_v22 = vld [vmem:[%s1012_s6] ss:$0 sm:$0xff] }
 0x151   :  { %704 = vmatprep.subr.bf16.mxu1 %v746_v23 }
 0x154   :  { %712 = vmatpush3.bf16.msra.mxu1 %v746_v23 }
 0x155   :  { %705 = vmatprep.subr.bf16.mxu1 %v747_v24 }
 0x158   :  { %713 = vmatpush3.bf16.msra.mxu1 %v747_v24 }
 0x159   :  { %706 = vmatprep.subr.bf16.mxu1 %v748_v25 }
 0x15c   :  { %714 = vmatpush3.bf16.msra.mxu1 %v748_v25 }
 0x15d   :  { %707 = vmatprep.subr.bf16.mxu1 %v749_v55 }
 0x160   :  { %715 = vmatpush3.bf16.msra.mxu1 %v749_v55 }
 0x161   :  { %708 = vmatprep.subr.bf16.mxu1 %v750_v56 }
 0x164   :  { %716 = vmatpush3.bf16.msra.mxu1 %v750_v56 }
 0x21a   :  { %v671_v58 = vpop.f32.mrb[0].mxu1 }
 0x21b   :  { %v376_v59 = vadd.f32 %v671_v58, %v575_v57  ;;  %v367_v60 = vpop.f32.mrb[1].mxu1 }
 0x21c   :  { %v368_v61 = vadd.f32 %v575_v57, %v367_v60  ;;  %v672_v62 = vpop.f32.mrb[2].mxu1 }
 0x21d   :  { %v379_v63 = vadd.f32 %v672_v62, %v575_v57  ;;  %v370_v0 = vpop.f32.mrb[3].mxu1  ;;  %v400_v2 = vmax.f32 %v376_v59, 0.0 }
 0x21e   :  { %v371_v1 = vadd.f32 %v575_v57, %v370_v0  ;;  %v398_v4 = vmax.f32 %v368_v61, 0.0 }
 0x21f   :  { %v401_v3 = vmax.f32 %v379_v63, 0.0 }
 0x220   :  { %v399_v5 = vmax.f32 %v371_v1, 0.0 }
 0x221   :  { %v407_v6 = vpack.c.bf16 %v401_v3, %v400_v2 }
 0x222   :  { %v406_v7 = vpack.c.bf16 %v399_v5, %v398_v4  ;;  %v675_v8 = vpop.f32.mrb[4].mxu1 }
 0x223   :  { %v392_v9 = vadd.f32 %v675_v8, %v575_v57  ;;  %v383_v10 = vpop.f32.mrb[5].mxu1 }
 0x224   :  { %v384_v11 = vadd.f32 %v575_v57, %v383_v10  ;;  %v676_v12 = vpop.f32.mrb[6].mxu1  ;;  %693 = vmatprep.mubr.bf16.mxu0 %v406_v7 }
 0x225   :  { %v395_v13 = vadd.f32 %v676_v12, %v575_v57  ;;  %v386_v14 = vpop.f32.mrb[7].mxu1  ;;  %694 = vmatmul.mubr.bf16.vlgmr.msra.gmra.mrb[8].mxu0 %v407_v6  ;;  %v404_v16 = vmax.f32 %v392_v9, 0.0 }
 0x226   :  { %v387_v15 = vadd.f32 %v575_v57, %v386_v14  ;;  %v402_v18 = vmax.f32 %v384_v11, 0.0 }
 0x227   :  { %v405_v17 = vmax.f32 %v395_v13, 0.0 }
 0x228   :  { %v403_v19 = vmax.f32 %v387_v15, 0.0 }
 0x229   :  { %v409_v20 = vpack.c.bf16 %v405_v17, %v404_v16 }
 0x22a   :  { %v408_v21 = vpack.c.bf16 %v403_v19, %v402_v18 }
 0x22c   :  { %697 = vmatprep.mubr.bf16.mxu1 %v408_v21 }
 0x22d   :  { %698 = vmatmul.mubr.bf16.vlgmr.msra.gmra.mrb[8].mxu1 %v409_v20 }
 0x2f8   :  { %v695_v23 = vpop.f32.mrb[8].mxu0 }
 0x2f9   :  { %v524_v24 = vadd.f32 %v695_v23, %v584_v22  ;;  %v515_v25 = vpop.f32.mrb[9].mxu0 }
 0x2fa   :  { %v516_v26 = vadd.f32 %v584_v22, %v515_v25  ;;  %v696_v27 = vpop.f32.mrb[10].mxu0 }
 0x2fb   :  { %549 = vst.msk [vmem:[%s1013_s7 + $0x10] sm:$0xff] %vm546_vm0, %v524_v24  ;;  %v527_v28 = vadd.f32 %v696_v27, %v584_v22  ;;  %v518_v29 = vpop.f32.mrb[11].mxu0 }
 0x2fc   :  { %547 = vst.msk [vmem:[%s1013_s7] sm:$0xff] %vm546_vm0, %v516_v26  ;;  %v519_v30 = vadd.f32 %v584_v22, %v518_v29 }
 0x2fd   :  { %550 = vst.msk [vmem:[%s1013_s7 + $0x18] sm:$0xff] %vm546_vm0, %v527_v28 }
 0x2fe   :  { %548 = vst.msk [vmem:[%s1013_s7 + $0x8] sm:$0xff] %vm546_vm0, %v519_v30 }
 0x300   :  { %v699_v31 = vpop.f32.mrb[8].mxu1 }
 0x301   :  { %v540_v32 = vadd.f32 %v699_v31, %v584_v22  ;;  %v531_v33 = vpop.f32.mrb[9].mxu1 }
 0x302   :  { %v532_v34 = vadd.f32 %v584_v22, %v531_v33  ;;  %v700_v35 = vpop.f32.mrb[10].mxu1 }
 0x303   :  { %553 = vst.msk [vmem:[%s1013_s7 + $0x30] sm:$0xff] %vm546_vm0, %v540_v32  ;;  %v543_v36 = vadd.f32 %v700_v35, %v584_v22  ;;  %v534_v37 = vpop.f32.mrb[11].mxu1 }
 0x304   :  { %551 = vst.msk [vmem:[%s1013_s7 + $0x20] sm:$0xff] %vm546_vm0, %v532_v34  ;;  %v535_v38 = vadd.f32 %v584_v22, %v534_v37 }
 0x305   :  { %554 = vst.msk [vmem:[%s1013_s7 + $0x38] sm:$0xff] %vm546_vm0, %v543_v36 }
 0x306   :  { %552 = vst.msk [vmem:[%s1013_s7 + $0x28] sm:$0xff] %vm546_vm0, %v535_v38 }
 0x307   :  { %559 = vsyncpa [#allocation3], 1 }
 0x308   :  { %560 = vsyncpa [#allocation5], 1 }
 0x309   :  { %561 = vsyncpa [#allocation8], 1 }

// kernel: tpu_custom_call.1
= control target key start
LH: loop header
LB: loop body
LE: loop exit
PB: predicated region body
PF: predicated region fallthrough
CT: control target
= control target key end

     0   :  { %12 = vsyncpa [#allocation3], 0  ;;  %s1006_s0 = inlined_call_operand.hbm [shape: bf16[64,128], index: 0, kind: input, shape index: {}]   ;;  %s1007_s1 = inlined_call_operand.hbm [shape: bf16[128,128], index: 1, kind: input, shape index: {}]   ;;  %s1008_s2 = inlined_call_operand.vmem [shape: f32[1,128], index: 2, kind: input, shape index: {}]   ;;  %s1009_s3 = inlined_call_operand.hbm [shape: bf16[128,128], index: 3, kind: input, shape index: {}]   ;;  %s1010_s4 = inlined_call_operand.vmem [shape: f32[1,128], index: 4, kind: input, shape index: {}]   ;;  %s1011_s5 = inlined_call_operand.hbm [shape: bf16[128,128], index: 5, kind: input, shape index: {}]   ;;  %s1012_s6 = inlined_call_operand.vmem [shape: f32[1,128], index: 6, kind: input, shape index: {}]   ;;  %s1013_s7 = inlined_call_operand.vmem [shape: f32[64,8], index: 7, kind: output, shape index: {}]  }
   0x1   :  { %13 = vsyncpa [#allocation5], 0 }
   0x2   :  { %14 = vsyncpa [#allocation8], 0  ;;  %s845_s24 = smov [#allocation4]   ;;  %s846_s26 = smov [#allocation2]  }
   0x3   :  { %s32_s25 = sshll.u32 %s845_s24, 4  ;;  %s20_s27 = sshll.u32 %s846_s26, 4  ;;  %s33_s25 = int_to_ptr.vmem [resolvable:$true] %s32_s25  ;;  %s891_s27 = int_to_ptr.vmem [resolvable:$true] %s20_s27 }
   0x4   :  { %s751_s30 = scalar_lea.hbm %s1007_s1, 1024 }
   0x5   :  { %p752_p0 = scmp.ne.s32.totalorder %s1007_s1, %s751_s30  ;;  %p755_p1 = scmp.lt.u32.totalorder %s751_s30, %s1007_s1 }
   0x7   :  { %p757_p2 = pnand %p755_p1, %p752_p0 }
   0x9   :  { %760 = shalt.err (!%p757_p2)
}
   0xa   :  { %s761_s12 = scalar_lea.vmem %s33_s25, 1024  ;;  %p766_p4 = scmp.lt.s32.totalorder %s33_s25, %s33_s25 }
   0xb   :  { %p762_p3 = scmp.ne.s32.totalorder %s33_s25, %s761_s12  ;;  %p767_p5 = scmp.lt.s32.totalorder %s761_s12, %s761_s12 }
   0xd   :  { %p768_p6 = por %p767_p5, %p766_p4 }
   0xf   :  { %p769_p7 = pnand %p768_p6, %p762_p3 }
  0x11   :  { %772 = shalt.err (!%p769_p7)
}
  0x12   :  { %s847_s13 = smov 64   ;;  %s848_s14 = smov 4  }
  0x13   :  { %38 = dma.hbm_to_vmem [thread:$0]  %s1007_s1, 1024, %s33_s25, [#allocation5], %s847_s13, %s847_s13, %s848_s14  }
  0x14   :  { %s773_s19 = scalar_lea.hbm %s1006_s0, 512 }
  0x15   :  { %p774_p8 = scmp.ne.s32.totalorder %s1006_s0, %s773_s19  ;;  %p777_p9 = scmp.lt.u32.totalorder %s773_s19, %s1006_s0 }
  0x17   :  { %p779_p10 = pnand %p777_p9, %p774_p8 }
  0x19   :  { %782 = shalt.err (!%p779_p10)
}
  0x1a   :  { %s783_s24 = scalar_lea.vmem %s891_s27, 512  ;;  %p788_p12 = scmp.lt.s32.totalorder %s891_s27, %s891_s27 }
  0x1b   :  { %p784_p11 = scmp.ne.s32.totalorder %s891_s27, %s783_s24  ;;  %p789_p13 = scmp.lt.s32.totalorder %s783_s24, %s783_s24 }
  0x1d   :  { %p790_p0 = por %p789_p13, %p788_p12 }
  0x1f   :  { %p791_p1 = pnand %p790_p0, %p784_p11 }
  0x21   :  { %794 = shalt.err (!%p791_p1)
}
  0x22   :  { %26 = dma.hbm_to_vmem [thread:$0]  %s1006_s0, 512, %s891_s27, [#allocation3], %s847_s13, %s847_s13, %s848_s14  }
  0x23   :  { %s849_s26 = smov [#allocation6]   ;;  %s850_s29 = smov [#allocation7]  }
  0x24   :  { %s46_s28 = sshll.u32 %s849_s26, 4  ;;  %s60_s30 = sshll.u32 %s850_s29, 4  ;;  %s47_s28 = int_to_ptr.vmem [resolvable:$true] %s46_s28  ;;  %s928_s30 = int_to_ptr.vmem [resolvable:$true] %s60_s30 }
  0x25   :  { %s795_s10 = scalar_lea.hbm %s1009_s3, 1024 }
  0x26   :  { %p796_p2 = scmp.ne.s32.totalorder %s1009_s3, %s795_s10  ;;  %p799_p3 = scmp.lt.u32.totalorder %s795_s10, %s1009_s3 }
  0x28   :  { %p801_p4 = pnand %p799_p3, %p796_p2 }
  0x2a   :  { %804 = shalt.err (!%p801_p4)
}
  0x2b   :  { %s805_s0 = scalar_lea.vmem %s47_s28, 1024  ;;  %p810_p6 = scmp.lt.s32.totalorder %s47_s28, %s47_s28 }
  0x2c   :  { %p806_p5 = scmp.ne.s32.totalorder %s47_s28, %s805_s0  ;;  %p811_p7 = scmp.lt.s32.totalorder %s805_s0, %s805_s0 }
  0x2e   :  { %p812_p8 = por %p811_p7, %p810_p6 }
  0x30   :  { %p813_p9 = pnand %p812_p8, %p806_p5 }
  0x32   :  { %816 = shalt.err (!%p813_p9)
}
  0x33   :  { %52 = dma.hbm_to_vmem [thread:$0]  %s1009_s3, 1024, %s47_s28, [#allocation5], %s847_s13, %s847_s13, %s848_s14  }
  0x34   :  { %s817_s20 = scalar_lea.hbm %s1011_s5, 1024 }
  0x35   :  { %p818_p10 = scmp.ne.s32.totalorder %s1011_s5, %s817_s20  ;;  %p821_p11 = scmp.lt.u32.totalorder %s817_s20, %s1011_s5 }
  0x37   :  { %p823_p12 = pnand %p821_p11, %p818_p10 }
  0x39   :  { %826 = shalt.err (!%p823_p12)
}
  0x3a   :  { %s827_s1 = scalar_lea.vmem %s928_s30, 1024  ;;  %p832_p0 = scmp.lt.s32.totalorder %s928_s30, %s928_s30 }
  0x3b   :  { %p828_p13 = scmp.ne.s32.totalorder %s928_s30, %s827_s1  ;;  %p833_p1 = scmp.lt.s32.totalorder %s827_s1, %s827_s1 }
  0x3d   :  { %p834_p2 = por %p833_p1, %p832_p0 }
  0x3f   :  { %p835_p3 = pnand %p834_p2, %p828_p13 }
  0x41   :  { %838 = shalt.err (!%p835_p3)
}
  0x42   :  { %66 = dma.hbm_to_vmem [thread:$0]  %s1011_s5, 1024, %s928_s30, [#allocation8], %s847_s13, %s847_s13, %s848_s14  }
  0x43   :  { %839 = dma.done.wait [#allocation3], 512  }
  0x44   :  { %840 = vsyncadd [#allocation3], 4294966784 }
  0x45   :  { %841 = dma.done.wait [#allocation5], 2048  }
  0x46   :  { %842 = vsyncadd [#allocation5], 4294965248 }
  0x47   :  { %843 = dma.done.wait [#allocation8], 1024  }
  0x48   :  { %844 = vsyncadd [#allocation8], 4294966272  ;;  %v723_v0 = vld [vmem:[#allocation4] sm:$0xff]   ;;  %v724_v1 = vld [vmem:[#allocation4 + $0x8] sm:$0xff]   ;;  %vm546_vm0 = vcmask 64512  }
  0x49   :  { %629 = vmatprep.subr.bf16.mxu0 %v723_v0  ;;  %v725_v2 = vld [vmem:[#allocation4 + $0x10] sm:$0xff]   ;;  %v726_v3 = vld [vmem:[#allocation4 + $0x18] sm:$0xff]   ;;  %v731_v4 = vld [vmem:[#allocation2] sm:$0xff]  }
  0x4a   :  { %630 = vmatpush3.bf16.msra.mxu0 %v723_v0  ;;  %645 = vmatprep.mubr.bf16.mxu0 %v731_v4  ;;  %v727_v5 = vld [vmem:[#allocation4 + $0x20] sm:$0xff]   ;;  %v736_v7 = vld [vmem:[#allocation6 + $0x8] sm:$0xff]   ;;  %v737_v9 = vld [vmem:[#allocation6 + $0x10] sm:$0xff]  }
  0x4b   :  { %631 = vmatprep.subr.bf16.mxu0 %v724_v1  ;;  %v735_v6 = vld [vmem:[#allocation6] sm:$0xff]   ;;  %v728_v8 = vld [vmem:[#allocation4 + $0x28] sm:$0xff]   ;;  %v729_v10 = vld [vmem:[#allocation4 + $0x30] sm:$0xff]  }
  0x4c   :  { %653 = vmatprep.subr.bf16.mxu1 %v735_v6  ;;  %v738_v11 = vld [vmem:[#allocation6 + $0x18] sm:$0xff]   ;;  %v739_v13 = vld [vmem:[#allocation6 + $0x20] sm:$0xff]   ;;  %v740_v14 = vld [vmem:[#allocation6 + $0x28] sm:$0xff]  }
  0x4d   :  { %654 = vmatpush3.bf16.msra.mxu1 %v735_v6  ;;  %v730_v12 = vld [vmem:[#allocation4 + $0x38] sm:$0xff]   ;;  %v732_v15 = vld [vmem:[#allocation2 + $0x8] sm:$0xff]   ;;  %v733_v16 = vld [vmem:[#allocation2 + $0x10] sm:$0xff]  }
  0x4e   :  { %632 = vmatpush3.bf16.msra.mxu0 %v724_v1  ;;  %655 = vmatprep.subr.bf16.mxu1 %v736_v7  ;;  %v734_v17 = vld [vmem:[#allocation2 + $0x18] sm:$0xff]   ;;  %v741_v18 = vld [vmem:[#allocation6 + $0x30] sm:$0xff]   ;;  %v743_v20 = vld [vmem:[#allocation7] sm:$0xff]  }
  0x4f   :  { %633 = vmatprep.subr.bf16.mxu0 %v725_v2  ;;  %v742_v19 = vld [vmem:[#allocation6 + $0x38] sm:$0xff]   ;;  %v744_v21 = vld [vmem:[#allocation7 + $0x8] sm:$0xff]   ;;  %v745_v22 = vld [vmem:[#allocation7 + $0x10] sm:$0xff]  }
  0x50   :  { %v746_v23 = vld [vmem:[#allocation7 + $0x18] sm:$0xff]   ;;  %v747_v24 = vld [vmem:[#allocation7 + $0x20] sm:$0xff]   ;;  %v748_v25 = vld [vmem:[#allocation7 + $0x28] sm:$0xff]  }
  0x51   :  { %656 = vmatpush3.bf16.msra.mxu1 %v736_v7  ;;  %v562_v26 = vld [vmem:[%s1008_s2] ss:$0 sm:$0xff]  ;;  %v749_v55 = vld [vmem:[#allocation7 + $0x30] sm:$0xff]   ;;  %v750_v56 = vld [vmem:[#allocation7 + $0x38] sm:$0xff]  }
  0x52   :  { %634 = vmatpush3.bf16.msra.mxu0 %v725_v2  ;;  %657 = vmatprep.subr.bf16.mxu1 %v737_v9  ;;  %v575_v57 = vld [vmem:[%s1010_s4] ss:$0 sm:$0xff] }
  0x53   :  { %635 = vmatprep.subr.bf16.mxu0 %v726_v3 }
  0x55   :  { %658 = vmatpush3.bf16.msra.mxu1 %v737_v9 }
  0x56   :  { %636 = vmatpush3.bf16.msra.mxu0 %v726_v3  ;;  %659 = vmatprep.subr.bf16.mxu1 %v738_v11 }
  0x57   :  { %637 = vmatprep.subr.bf16.mxu0 %v727_v5 }
  0x59   :  { %660 = vmatpush3.bf16.msra.mxu1 %v738_v11 }
  0x5a   :  { %638 = vmatpush3.bf16.msra.mxu0 %v727_v5  ;;  %661 = vmatprep.subr.bf16.mxu1 %v739_v13 }
  0x5b   :  { %639 = vmatprep.subr.bf16.mxu0 %v728_v8 }
  0x5d   :  { %662 = vmatpush3.bf16.msra.mxu1 %v739_v13 }
  0x5e   :  { %640 = vmatpush3.bf16.msra.mxu0 %v728_v8  ;;  %663 = vmatprep.subr.bf16.mxu1 %v740_v14 }
  0x5f   :  { %641 = vmatprep.subr.bf16.mxu0 %v729_v10 }
  0x61   :  { %664 = vmatpush3.bf16.msra.mxu1 %v740_v14 }
  0x62   :  { %642 = vmatpush3.bf16.msra.mxu0 %v729_v10  ;;  %665 = vmatprep.subr.bf16.mxu1 %v741_v18 }
  0x63   :  { %643 = vmatprep.subr.bf16.mxu0 %v730_v12 }
  0x65   :  { %666 = vmatpush3.bf16.msra.mxu1 %v741_v18 }
  0x66   :  { %644 = vmatpush3.bf16.msra.mxu0 %v730_v12  ;;  %667 = vmatprep.subr.bf16.mxu1 %v742_v19 }
  0x67   :  { %677 = vmatprep.subr.bf16.mxu0 %v743_v20 }
  0x69   :  { %646 = vmatmul.mubr.bf16.vlgmr.msra.gmra.mrb[0].mxu0 %v732_v15  ;;  %668 = vmatpush3.bf16.msra.mxu1 %v742_v19 }
  0x6a   :  { %649 = vmatprep.mubr.bf16.mxu0 %v733_v16  ;;  %701 = vmatprep.subr.bf16.mxu1 %v743_v20 }
  0x6b   :  { %678 = vmatpush3.bf16.msra.mxu0 %v743_v20 }
  0x6c   :  { %679 = vmatprep.subr.bf16.mxu0 %v744_v21 }
  0x6f   :  { %680 = vmatpush3.bf16.msra.mxu0 %v744_v21 }
  0x70   :  { %681 = vmatprep.subr.bf16.mxu0 %v745_v22 }
  0x71   :  { %650 = vmatmul.mubr.bf16.gmra.mrb[4].mxu0 %v734_v17 }
  0x73   :  { %682 = vmatpush3.bf16.msra.mxu0 %v745_v22 }
  0x74   :  { %683 = vmatprep.subr.bf16.mxu0 %v746_v23 }
  0x77   :  { %684 = vmatpush3.bf16.msra.mxu0 %v746_v23 }
  0x78   :  { %685 = vmatprep.subr.bf16.mxu0 %v747_v24 }
  0x7b   :  { %686 = vmatpush3.bf16.msra.mxu0 %v747_v24 }
  0x7c   :  { %687 = vmatprep.subr.bf16.mxu0 %v748_v25 }
  0x7f   :  { %688 = vmatpush3.bf16.msra.mxu0 %v748_v25 }
  0x80   :  { %689 = vmatprep.subr.bf16.mxu0 %v749_v55 }
  0x83   :  { %690 = vmatpush3.bf16.msra.mxu0 %v749_v55 }
  0x84   :  { %691 = vmatprep.subr.bf16.mxu0 %v750_v56 }
  0x87   :  { %692 = vmatpush3.bf16.msra.mxu0 %v750_v56 }
 0x13c   :  { %v647_v27 = vpop.f32.mrb[0].mxu0 }
 0x13d   :  { %v228_v28 = vadd.f32 %v647_v27, %v562_v26  ;;  %v219_v29 = vpop.f32.mrb[1].mxu0 }
 0x13e   :  { %v220_v30 = vadd.f32 %v562_v26, %v219_v29  ;;  %v648_v31 = vpop.f32.mrb[2].mxu0 }
 0x13f   :  { %v231_v32 = vadd.f32 %v648_v31, %v562_v26  ;;  %v222_v33 = vpop.f32.mrb[3].mxu0  ;;  %v252_v35 = vmax.f32 %v228_v28, 0.0 }
 0x140   :  { %v223_v34 = vadd.f32 %v562_v26, %v222_v33  ;;  %v250_v37 = vmax.f32 %v220_v30, 0.0 }
 0x141   :  { %v253_v36 = vmax.f32 %v231_v32, 0.0 }
 0x142   :  { %v251_v38 = vmax.f32 %v223_v34, 0.0 }
 0x143   :  { %v259_v39 = vpack.c.bf16 %v253_v36, %v252_v35 }
 0x144   :  { %v651_v40 = vpop.f32.mrb[4].mxu0  ;;  %v258_v41 = vpack.c.bf16 %v251_v38, %v250_v37 }
 0x145   :  { %v244_v42 = vadd.f32 %v651_v40, %v562_v26  ;;  %v235_v43 = vpop.f32.mrb[5].mxu0 }
 0x146   :  { %v236_v44 = vadd.f32 %v562_v26, %v235_v43  ;;  %v652_v45 = vpop.f32.mrb[6].mxu0  ;;  %669 = vmatprep.mubr.bf16.mxu1 %v258_v41 }
 0x147   :  { %v247_v46 = vadd.f32 %v652_v45, %v562_v26  ;;  %v238_v47 = vpop.f32.mrb[7].mxu0  ;;  %670 = vmatmul.mubr.bf16.vlgmr.msra.gmra.mrb[0].mxu1 %v259_v39  ;;  %v256_v49 = vmax.f32 %v244_v42, 0.0 }
 0x148   :  { %v239_v48 = vadd.f32 %v562_v26, %v238_v47  ;;  %709 = vmatpush3.bf16.msra.mxu1 %v743_v20  ;;  %v254_v51 = vmax.f32 %v236_v44, 0.0 }
 0x149   :  { %v257_v50 = vmax.f32 %v247_v46, 0.0  ;;  %702 = vmatprep.subr.bf16.mxu1 %v744_v21 }
 0x14a   :  { %v255_v52 = vmax.f32 %v239_v48, 0.0 }
 0x14b   :  { %v261_v53 = vpack.c.bf16 %v257_v50, %v256_v49 }
 0x14c   :  { %v260_v54 = vpack.c.bf16 %v255_v52, %v254_v51  ;;  %710 = vmatpush3.bf16.msra.mxu1 %v744_v21 }
 0x14d   :  { %703 = vmatprep.subr.bf16.mxu1 %v745_v22 }
 0x14e   :  { %673 = vmatprep.mubr.bf16.mxu1 %v260_v54 }
 0x14f   :  { %674 = vmatmul.mubr.bf16.gmra.mrb[4].mxu1 %v261_v53 }
 0x150   :  { %711 = vmatpush3.bf16.msra.mxu1 %v745_v22  ;;  %v584_v22 = vld [vmem:[%s1012_s6] ss:$0 sm:$0xff] }
 0x151   :  { %704 = vmatprep.subr.bf16.mxu1 %v746_v23 }
 0x154   :  { %712 = vmatpush3.bf16.msra.mxu1 %v746_v23 }
 0x155   :  { %705 = vmatprep.subr.bf16.mxu1 %v747_v24 }
 0x158   :  { %713 = vmatpush3.bf16.msra.mxu1 %v747_v24 }
 0x159   :  { %706 = vmatprep.subr.bf16.mxu1 %v748_v25 }
 0x15c   :  { %714 = vmatpush3.bf16.msra.mxu1 %v748_v25 }
 0x15d   :  { %707 = vmatprep.subr.bf16.mxu1 %v749_v55 }
 0x160   :  { %715 = vmatpush3.bf16.msra.mxu1 %v749_v55 }
 0x161   :  { %708 = vmatprep.subr.bf16.mxu1 %v750_v56 }
 0x164   :  { %716 = vmatpush3.bf16.msra.mxu1 %v750_v56 }
 0x21a   :  { %v671_v58 = vpop.f32.mrb[0].mxu1 }
 0x21b   :  { %v376_v59 = vadd.f32 %v671_v58, %v575_v57  ;;  %v367_v60 = vpop.f32.mrb[1].mxu1 }
 0x21c   :  { %v368_v61 = vadd.f32 %v575_v57, %v367_v60  ;;  %v672_v62 = vpop.f32.mrb[2].mxu1 }
 0x21d   :  { %v379_v63 = vadd.f32 %v672_v62, %v575_v57  ;;  %v370_v0 = vpop.f32.mrb[3].mxu1  ;;  %v400_v2 = vmax.f32 %v376_v59, 0.0 }
 0x21e   :  { %v371_v1 = vadd.f32 %v575_v57, %v370_v0  ;;  %v398_v4 = vmax.f32 %v368_v61, 0.0 }
 0x21f   :  { %v401_v3 = vmax.f32 %v379_v63, 0.0 }
 0x220   :  { %v399_v5 = vmax.f32 %v371_v1, 0.0 }
 0x221   :  { %v407_v6 = vpack.c.bf16 %v401_v3, %v400_v2 }
 0x222   :  { %v406_v7 = vpack.c.bf16 %v399_v5, %v398_v4  ;;  %v675_v8 = vpop.f32.mrb[4].mxu1 }
 0x223   :  { %v392_v9 = vadd.f32 %v675_v8, %v575_v57  ;;  %v383_v10 = vpop.f32.mrb[5].mxu1 }
 0x224   :  { %v384_v11 = vadd.f32 %v575_v57, %v383_v10  ;;  %v676_v12 = vpop.f32.mrb[6].mxu1  ;;  %693 = vmatprep.mubr.bf16.mxu0 %v406_v7 }
 0x225   :  { %v395_v13 = vadd.f32 %v676_v12, %v575_v57  ;;  %v386_v14 = vpop.f32.mrb[7].mxu1  ;;  %694 = vmatmul.mubr.bf16.vlgmr.msra.gmra.mrb[8].mxu0 %v407_v6  ;;  %v404_v16 = vmax.f32 %v392_v9, 0.0 }
 0x226   :  { %v387_v15 = vadd.f32 %v575_v57, %v386_v14  ;;  %v402_v18 = vmax.f32 %v384_v11, 0.0 }
 0x227   :  { %v405_v17 = vmax.f32 %v395_v13, 0.0 }
 0x228   :  { %v403_v19 = vmax.f32 %v387_v15, 0.0 }
 0x229   :  { %v409_v20 = vpack.c.bf16 %v405_v17, %v404_v16 }
 0x22a   :  { %v408_v21 = vpack.c.bf16 %v403_v19, %v402_v18 }
 0x22c   :  { %697 = vmatprep.mubr.bf16.mxu1 %v408_v21 }
 0x22d   :  { %698 = vmatmul.mubr.bf16.vlgmr.msra.gmra.mrb[8].mxu1 %v409_v20 }
 0x2f8   :  { %v695_v23 = vpop.f32.mrb[8].mxu0 }
 0x2f9   :  { %v524_v24 = vadd.f32 %v695_v23, %v584_v22  ;;  %v515_v25 = vpop.f32.mrb[9].mxu0 }
 0x2fa   :  { %v516_v26 = vadd.f32 %v584_v22, %v515_v25  ;;  %v696_v27 = vpop.f32.mrb[10].mxu0 }
 0x2fb   :  { %549 = vst.msk [vmem:[%s1013_s7 + $0x10] sm:$0xff] %vm546_vm0, %v524_v24  ;;  %v527_v28 = vadd.f32 %v696_v27, %v584_v22  ;;  %v518_v29 = vpop.f32.mrb[11].mxu0 }
 0x2fc   :  { %547 = vst.msk [vmem:[%s1013_s7] sm:$0xff] %vm546_vm0, %v516_v26  ;;  %v519_v30 = vadd.f32 %v584_v22, %v518_v29 }
 0x2fd   :  { %550 = vst.msk [vmem:[%s1013_s7 + $0x18] sm:$0xff] %vm546_vm0, %v527_v28 }
 0x2fe   :  { %548 = vst.msk [vmem:[%s1013_s7 + $0x8] sm:$0xff] %vm546_vm0, %v519_v30 }
 0x300   :  { %v699_v31 = vpop.f32.mrb[8].mxu1 }
 0x301   :  { %v540_v32 = vadd.f32 %v699_v31, %v584_v22  ;;  %v531_v33 = vpop.f32.mrb[9].mxu1 }
 0x302   :  { %v532_v34 = vadd.f32 %v584_v22, %v531_v33  ;;  %v700_v35 = vpop.f32.mrb[10].mxu1 }
 0x303   :  { %553 = vst.msk [vmem:[%s1013_s7 + $0x30] sm:$0xff] %vm546_vm0, %v540_v32  ;;  %v543_v36 = vadd.f32 %v700_v35, %v584_v22  ;;  %v534_v37 = vpop.f32.mrb[11].mxu1 }
 0x304   :  { %551 = vst.msk [vmem:[%s1013_s7 + $0x20] sm:$0xff] %vm546_vm0, %v532_v34  ;;  %v535_v38 = vadd.f32 %v584_v22, %v534_v37 }
 0x305   :  { %554 = vst.msk [vmem:[%s1013_s7 + $0x38] sm:$0xff] %vm546_vm0, %v543_v36 }
 0x306   :  { %552 = vst.msk [vmem:[%s1013_s7 + $0x28] sm:$0xff] %vm546_vm0, %v535_v38 }
 0x307   :  { %559 = vsyncpa [#allocation3], 1 }
 0x308   :  { %560 = vsyncpa [#allocation5], 1 }
 0x309   :  { %561 = vsyncpa [#allocation8], 1 }

</bundles_post_ra>
